<compile_context>
chip_gen: v6e
topology: v6e:2x2x1
jax: 0.10.0
libtpu: 0.0.40
codegen_flags: <defaults>
</compile_context>

<pallas_src>
import jax
import jax.numpy as jnp
from jax.experimental import pallas as pl
from jax.experimental.pallas import tpu as pltpu


def _silu_kernel(x_ref, o_ref):
    x = x_ref[...]
    # Compute in f32 regardless of storage dtype: the upcast only touches
    # vregs (free for a memory-bound kernel) and matches PyTorch's opmath
    # behaviour for half/bf16 inputs.
    xf = x.astype(jnp.float32)
    if o_ref.dtype == jnp.bfloat16 or o_ref.dtype == jnp.float16:
        # exp on the EUP + approx reciprocal (rel. error ~2^-12, far below
        # bf16 precision) keeps the kernel HBM-bound even at v7x bandwidth.
        sig = pl.reciprocal(1.0 + jnp.exp(-xf), approx=True)
    else:
        sig = jax.nn.sigmoid(xf)
    o_ref[...] = (xf * sig).astype(o_ref.dtype)


def _chip_gen() -> int:
    """Best-effort TPU generation from device_kind; defaults to 6."""
    try:
        kind = jax.devices()[0].device_kind.lower()
    except Exception:
        return 6
    if "v7" in kind or "7x" in kind:
        return 7
    if "v6" in kind:
        return 6
    if "v5" in kind:
        return 5
    if "v4" in kind or "v3" in kind or "v2" in kind:
        return 4
    return 6


def _gen_params(gen):
    """(block_bytes, vmem_limit_bytes, split_across_tensorcores)."""
    if gen >= 7:
        # 2 TCs / 64 MiB VMEM per TC / 3.2 TB/s HBM.
        return 8 * 2**20, 56 * 2**20, True
    if gen == 6:
        # 1 TC / 128 MiB VMEM / 1.4 TB/s HBM.
        return 12 * 2**20, 64 * 2**20, False
    # v5e and older: keep 4x double-buffered blocks inside the 16 MiB
    # scoped-VMEM default (no vmem_limit override needed).
    return 3 * 2**20, None, False


def _silu_flat(flat: jax.Array) -> jax.Array:
    """SiLU on a flat array whose size is a multiple of 128."""
    n = flat.size
    dtype = flat.dtype
    itemsize = jnp.dtype(dtype).itemsize

    # Widest lane-dense last dim that divides n (never pay a padding copy).
    lane = 128
    for cand in (1024, 512, 256):
        if n % cand == 0:
            lane = cand
            break
    rows = n // lane
    x2d = flat.reshape(rows, lane)

    gen = _chip_gen()
    block_bytes, vmem_limit, split_tc = _gen_params(gen)

    # dtype-native sublane packing: 8 rows (f32), 16 (bf16/f16), 32 (int8/fp8).
    sublane = max(8, 32 // itemsize)
    bytes_per_row = lane * itemsize
    max_rows = max(sublane, (block_bytes // bytes_per_row) // sublane * sublane)

    if rows <= max_rows:
        if split_tc and rows >= 2 * sublane:
            # v7x only: 2 grid steps so both TensorCores (and both HBM pipes)
            # are busy.  On 1-TC chips the grid is a serial loop, so no split.
            tile_rows = -(-((rows + 1) // 2) // sublane) * sublane
        else:
            tile_rows = rows  # block == full array dims (allowed by (8,128) rule)
    else:
        tile_rows = max_rows
        if split_tc:
            g = pl.cdiv(rows, tile_rows)
            if 1 < g <= 8 and g % 2 == 1:
                # Few-block case on v7x: prefer an even number of grid steps.
                # Allow up to 1.5x the byte target (4x double-buffers still
                # fit comfortably under vmem_limit).
                t = ((max_rows + max_rows // 2) // sublane) * sublane
                while t >= sublane:
                    if pl.cdiv(rows, t) % 2 == 0:
                        tile_rows = t
                        break
                    t -= sublane
    grid = (pl.cdiv(rows, tile_rows),)

    out2d = pl.pallas_call(
        _silu_kernel,
        out_shape=jax.ShapeDtypeStruct((rows, lane), dtype),
        grid_spec=pltpu.PrefetchScalarGridSpec(
            num_scalar_prefetch=0,
            grid=grid,
            in_specs=[pl.BlockSpec((tile_rows, lane), lambda i: (i, 0))],
            out_specs=pl.BlockSpec((tile_rows, lane), lambda i: (i, 0)),
        ),
        compiler_params=pltpu.CompilerParams(
            dimension_semantics=("parallel",),
            vmem_limit_bytes=vmem_limit,
        ),
        cost_estimate=pl.CostEstimate(
            flops=2 * n, transcendentals=n, bytes_accessed=2 * n * itemsize),
    )(x2d)
    return out2d.reshape(-1)


def silu(x: jax.Array) -> jax.Array:
    """Elementwise SiLU via a Pallas TPU kernel. Matches torch x * F.sigmoid(x)."""
    orig_shape = x.shape
    dtype = x.dtype
    n = x.size
    if n == 0:
        return x
    # TODO(synk): float64 inputs (x64 mode) are computed in f32; won't match a
    # torch double reference bit-for-bit.

    flat = x.reshape(-1)

    if n % 128 != 0:
        # Ragged size: run the kernel on the 128-aligned prefix and compute
        # the (<128-element) tail with plain jnp, instead of the old
        # pad+concat+slice path that added full-tensor HBM passes.
        # TODO(synk): mask the tail in-kernel (scalar-prefetch n + masked
        # store) to also drop the final concatenate pass.
        n_main = (n // 128) * 128
        head = _silu_flat(flat[:n_main]) if n_main else flat[:0]
        tail = flat[n_main:].astype(jnp.float32)
        tail = (tail * jax.nn.sigmoid(tail)).astype(dtype)
        return jnp.concatenate([head, tail]).reshape(orig_shape)

    return _silu_flat(flat).reshape(orig_shape)


if __name__ == "__main__":
    key = jax.random.PRNGKey(0)
    # NCHW input as in PyTorch conv-style modules
    x = jax.random.normal(key, (2, 4, 16, 16), dtype=jnp.float32)

    y = silu(x)
    jax.block_until_ready(y)

    # reference check against plain JAX
    y_ref = x * jax.nn.sigmoid(x)
    assert y.shape == x.shape and y.dtype == x.dtype
    assert jnp.allclose(y, y_ref, atol=1e-6, rtol=1e-6)

    print("KERNEL_OK")
</pallas_src>

<mosaic_0001>
module attributes {stable_mosaic.version = 11 : i64} {
  func.func @_silu_kernel(%arg0: i32, %arg1: memref<2x1024xf32, #tpu.memory_space<vmem>>, %arg2: memref<2x1024xf32, #tpu.memory_space<vmem>>) attributes {dimension_semantics = [#tpu.dimension_semantics<parallel>], iteration_bounds = array<i64: 1>, scalar_prefetch = 0 : i64, scratch_operands = 0 : i64, tpu.core_type = #tpu.core_type<tc>, window_params = [{transform_indices = @transform_0, window_bounds = array<i64: 2, 1024>}, {transform_indices = @transform_1, window_bounds = array<i64: 2, 1024>}]} {
    %c0 = arith.constant 0 : index
    %c0_0 = arith.constant 0 : index
    %0 = vector.load %arg1[%c0, %c0_0] : memref<2x1024xf32, #tpu.memory_space<vmem>>, vector<2x1024xf32>
    %1 = arith.negf %0 : vector<2x1024xf32>
    %2 = math.exp %1 : vector<2x1024xf32>
    %cst = arith.constant 1.000000e+00 : f32
    %3 = vector.broadcast %cst : f32 to vector<2x1024xf32>
    %4 = arith.addf %3, %2 : vector<2x1024xf32>
    %5 = arith.divf %3, %4 : vector<2x1024xf32>
    %6 = arith.mulf %0, %5 : vector<2x1024xf32>
    %c0_1 = arith.constant 0 : index
    %c0_2 = arith.constant 0 : index
    %7 = vector.load %arg2[%c0_1, %c0_2] : memref<2x1024xf32, #tpu.memory_space<vmem>>, vector<2x1024xf32>
    tpu.vector_store %arg2[%c0_1, %c0_2], %6 {strides = array<i32>} : memref<2x1024xf32, #tpu.memory_space<vmem>>, vector<2x1024xf32>,
    return
  }
  func.func @transform_0(%arg0: i32) -> (i32, i32) {
    %c0_i32 = arith.constant 0 : i32
    %c0_i32_0 = arith.constant 0 : i32
    return %arg0, %c0_i32 : i32, i32
  }
  func.func @transform_1(%arg0: i32) -> (i32, i32) {
    %c0_i32 = arith.constant 0 : i32
    %c0_i32_0 = arith.constant 0 : i32
    return %arg0, %c0_i32 : i32, i32
  }
}

</mosaic_0001>

<bundles_post_ra>
// kernel: tpu_custom_call.1
= control target key start
LH: loop header
LB: loop body
LE: loop exit
PB: predicated region body
PF: predicated region fallthrough
CT: control target
= control target key end

     0   :  { %6 = vsyncpa [#allocation3], 0  ;;  %s128_s0 = inlined_call_operand.hbm [shape: f32[2,1024], index: 0, kind: input, shape index: {}]   ;;  %s129_s1 = inlined_call_operand.hbm [shape: f32[2,1024], index: 1, kind: output, shape index: {}]  }
   0x1   :  { %7 = vsyncpa [#allocation4], 0  ;;  %s110_s6 = smov [#allocation2]  }
   0x2   :  { %s14_s7 = sshll.u32 %s110_s6, 4  ;;  %s15_s7 = int_to_ptr.vmem [resolvable:$true] %s14_s7 }
   0x3   :  { %s74_s8 = scalar_lea.vmem %s15_s7, 256  ;;  %p79_p1 = scmp.lt.s32.totalorder %s15_s7, %s15_s7 }
   0x4   :  { %p75_p0 = scmp.ne.s32.totalorder %s15_s7, %s74_s8  ;;  %p80_p2 = scmp.lt.s32.totalorder %s74_s8, %s74_s8 }
   0x6   :  { %p81_p3 = por %p80_p2, %p79_p1 }
   0x8   :  { %p82_p4 = pnand %p81_p3, %p75_p0 }
   0xa   :  { %85 = shalt.err (!%p82_p4)
}
   0xb   :  { %17 = dma.hbm_to_vmem [thread:$0]  %s128_s0, 256, %s15_s7, [#allocation3]  }
   0xc   :  { %106 = dma.done.wait [#allocation3], 256  }
   0xd   :  { %107 = vsyncadd [#allocation3], 4294967040  ;;  %v21_v0 = vld [vmem:[#allocation2] sm:$0xff]  ;;  %v22_v1 = vld [vmem:[#allocation2 + $0x8] sm:$0xff]  ;;  %s111_s11 = smov [#allocation5]  }
   0xe   :  { %v54_v2 = vmul.f32 -1.442695, %v21_v0  ;;  %v55_v3 = vmul.f32 -1.442695, %v22_v1  ;;  %s45_s12 = sshll.u32 %s111_s11, 4  ;;  %s46_s12 = int_to_ptr.vmem [resolvable:$true] %s45_s12 }
   0xf   :  { %s86_s0 = scalar_lea.vmem %s46_s12, 256  ;;  %p91_p6 = scmp.lt.s32.totalorder %s46_s12, %s46_s12 }
  0x10   :  { %58 = vpow2.f32 %v54_v2  ;;  %p87_p5 = scmp.ne.s32.totalorder %s46_s12, %s86_s0  ;;  %p92_p7 = scmp.lt.s32.totalorder %s86_s0, %s86_s0 }
  0x11   :  { %60 = vpow2.f32 %v55_v3 }
  0x12   :  { %p93_p8 = por %p92_p7, %p91_p6 }
  0x14   :  { %p94_p9 = pnand %p93_p8, %p87_p5 }
  0x1d   :  { %v59_v4 = vpop.eup %58 }
  0x1e   :  { %v61_v5 = vpop.eup %60  ;;  %v29_v6 = vadd.f32 1.0, %v59_v4 }
  0x1f   :  { %v30_v7 = vadd.f32 1.0, %v61_v5 }
  0x20   :  { %62 = vrcp.f32 %v29_v6 }
  0x21   :  { %64 = vrcp.f32 %v30_v7 }
  0x2d   :  { %v63_v8 = vpop.eup %62 }
  0x2e   :  { %v65_v9 = vpop.eup %64  ;;  %v35_v10 = vmul.f32 %v63_v8, %v21_v0 }
  0x2f   :  { %v36_v11 = vmul.f32 %v65_v9, %v22_v1 }
  0x30   :  { %37 = vst [vmem:[#allocation5] sm:$0xff] %v35_v10 }
  0x31   :  { %38 = vst [vmem:[#allocation5 + $0x8] sm:$0xff] %v36_v11 }
  0x32   :  { %97 = shalt.err (!%p94_p9)
}
  0x33   :  { %48 = dma.vmem_to_hbm [thread:$0]  %s46_s12, 256, %s129_s1, [#allocation4]  }
  0x34   :  { %108 = dma.done.wait [#allocation4], 256  }
  0x35   :  { %109 = vsyncadd [#allocation4], 4294967040 }
  0x36   :  { %52 = vsyncpa [#allocation3], 1 }
  0x37   :  { %53 = vsyncpa [#allocation4], 1 }

</bundles_post_ra>
